<compile_context>
chip_gen: v6e
topology: v6e:2x2x1
jax: 0.10.0
libtpu: 0.0.40
codegen_flags: <defaults>
</compile_context>

<pallas_src>
import functools

import jax
import jax.numpy as jnp
from jax.experimental import pallas as pl
from jax.experimental.pallas import tpu as pltpu

LANE = 128


def _round_up(n, m):
    return ((n + m - 1) // m) * m


def _pad2(a, rows, cols):
    return jnp.pad(a, ((0, rows - a.shape[0]), (0, cols - a.shape[1])))


def nbeats_block_kernel(x_ref,
                        w1_ref, b1_ref,
                        w2_ref, b2_ref,
                        w3_ref, b3_ref,
                        w4b_ref, b4b_ref,
                        w4f_ref, b4f_ref,
                        backcast_ref, forecast_ref):
    """Fused 4-layer MLP + generic-basis split, one batch tile per grid step.

    Weights arrive as bf16 (in, out) tiles; activations are cast to bf16 in
    front of each MXU dot, accumulation is f32, bias add + ReLU in f32.
    The fc4 weight is pre-split so backcast / forecast are produced by two
    direct dots (no theta slice inside the kernel).
    """
    h = x_ref[...].astype(jnp.bfloat16)

    h = jnp.dot(h, w1_ref[...], preferred_element_type=jnp.float32) + b1_ref[...]
    h = jnp.maximum(h, 0.0).astype(jnp.bfloat16)

    h = jnp.dot(h, w2_ref[...], preferred_element_type=jnp.float32) + b2_ref[...]
    h = jnp.maximum(h, 0.0).astype(jnp.bfloat16)

    h = jnp.dot(h, w3_ref[...], preferred_element_type=jnp.float32) + b3_ref[...]
    h = jnp.maximum(h, 0.0).astype(jnp.bfloat16)

    backcast_ref[...] = (
        jnp.dot(h, w4b_ref[...], preferred_element_type=jnp.float32) + b4b_ref[...]
    ).astype(backcast_ref.dtype)
    forecast_ref[...] = (
        jnp.dot(h, w4f_ref[...], preferred_element_type=jnp.float32) + b4f_ref[...]
    ).astype(forecast_ref.dtype)


@functools.partial(jax.jit, static_argnums=(2, 3, 4))
def nbeats_block(x, params, input_size, forecast_size, block_batch=256):
    """Wrapper: pads to lane-dense tiles, splits fc4, launches the kernel.

    x: (batch, input_size) float32.
    params: (w1, b1, w2, b2, w3, b3, w4, b4); weights stored (in, out),
            biases (1, out), all float32 (cast to bf16 / padded here).
    Returns (backcast (batch, input_size), forecast (batch, forecast_size)).
    """
    w1, b1, w2, b2, w3, b3, w4, b4 = params
    batch = x.shape[0]
    hidden = w1.shape[1]

    in_p = _round_up(input_size, LANE)
    hid_p = _round_up(hidden, LANE)
    bc_p = _round_up(input_size, LANE)
    fc_p = _round_up(forecast_size, LANE)

    # Split fc4 into backcast / forecast halves (GenericBasis) in the wrapper.
    w4b, w4f = w4[:, :input_size], w4[:, input_size:]
    b4b, b4f = b4[:, :input_size], b4[:, input_size:]

    # Zero-pad feature dims to 128 lanes; weights bf16, biases f32.
    # Zero padding guarantees padded lanes never leak into real outputs.
    w1p = _pad2(w1, in_p, hid_p).astype(jnp.bfloat16)
    w2p = _pad2(w2, hid_p, hid_p).astype(jnp.bfloat16)
    w3p = _pad2(w3, hid_p, hid_p).astype(jnp.bfloat16)
    w4bp = _pad2(w4b, hid_p, bc_p).astype(jnp.bfloat16)
    w4fp = _pad2(w4f, hid_p, fc_p).astype(jnp.bfloat16)
    b1p = _pad2(b1, 1, hid_p).astype(jnp.float32)
    b2p = _pad2(b2, 1, hid_p).astype(jnp.float32)
    b3p = _pad2(b3, 1, hid_p).astype(jnp.float32)
    b4bp = _pad2(b4b, 1, bc_p).astype(jnp.float32)
    b4fp = _pad2(b4f, 1, fc_p).astype(jnp.float32)

    # Batch tiling: TB rows per grid step (sublane-aligned), weights resident.
    tb = min(block_batch, _round_up(batch, 8))
    batch_p = _round_up(batch, tb)
    xp = jnp.pad(x.astype(jnp.float32),
                 ((0, batch_p - batch), (0, in_p - input_size)))
    grid = (batch_p // tb,)

    # Advisory cost estimate for XLA's scheduler.
    flops = 2 * batch_p * (in_p * hid_p + 2 * hid_p * hid_p
                           + hid_p * (bc_p + fc_p))
    bytes_accessed = (
        xp.size * 4
        + sum(int(w.size) * 2 for w in (w1p, w2p, w3p, w4bp, w4fp))
        + sum(int(b.size) * 4 for b in (b1p, b2p, b3p, b4bp, b4fp))
        + batch_p * (bc_p + fc_p) * 4
    )
    cost = pl.CostEstimate(flops=flops, transcendentals=0,
                           bytes_accessed=bytes_accessed)

    resident = lambda shape: pl.BlockSpec(shape, lambda i: (0, 0))

    out_shapes = (
        jax.ShapeDtypeStruct((batch_p, bc_p), jnp.float32),  # backcast (padded)
        jax.ShapeDtypeStruct((batch_p, fc_p), jnp.float32),  # forecast (padded)
    )

    back_p, fore_p = pl.pallas_call(
        nbeats_block_kernel,
        out_shape=out_shapes,
        grid_spec=pltpu.PrefetchScalarGridSpec(
            num_scalar_prefetch=0,
            grid=grid,
            in_specs=[
                pl.BlockSpec((tb, in_p), lambda i: (i, 0)),   # x: batch-tiled
                resident(w1p.shape), resident(b1p.shape),
                resident(w2p.shape), resident(b2p.shape),
                resident(w3p.shape), resident(b3p.shape),
                resident(w4bp.shape), resident(b4bp.shape),
                resident(w4fp.shape), resident(b4fp.shape),
            ],
            out_specs=[
                pl.BlockSpec((tb, bc_p), lambda i: (i, 0)),
                pl.BlockSpec((tb, fc_p), lambda i: (i, 0)),
            ],
        ),
        compiler_params=pltpu.CompilerParams(
            dimension_semantics=("parallel",),
        ),
        cost_estimate=cost,
    )(xp, w1p, b1p, w2p, b2p, w3p, b3p, w4bp, b4bp, w4fp, b4fp)

    # Slice padded lanes / rows back to the true problem size.
    return back_p[:batch, :input_size], fore_p[:batch, :forecast_size]


def init_params(key, input_size, hidden_size, theta_size):
    """Deterministic init (uniform, PyTorch-Linear-like bounds).
    Weights stored as (in, out) — transposed relative to nn.Linear."""
    def linear(k, fan_in, fan_out):
        kw, kb = jax.random.split(k)
        bound = 1.0 / jnp.sqrt(fan_in)
        w = jax.random.uniform(kw, (fan_in, fan_out), jnp.float32, -bound, bound)
        b = jax.random.uniform(kb, (1, fan_out), jnp.float32, -bound, bound)
        return w, b

    k1, k2, k3, k4 = jax.random.split(key, 4)
    w1, b1 = linear(k1, input_size, hidden_size)
    w2, b2 = linear(k2, hidden_size, hidden_size)
    w3, b3 = linear(k3, hidden_size, hidden_size)
    w4, b4 = linear(k4, hidden_size, theta_size)
    return (w1, b1, w2, b2, w3, b3, w4, b4)


def nbeats_block_ref(x, params, input_size):
    """Pure-JAX reference with the same bf16-weight / f32-accumulate recipe."""
    w1, b1, w2, b2, w3, b3, w4, b4 = params

    def lin(h, w, b):
        return jnp.dot(h.astype(jnp.bfloat16), w.astype(jnp.bfloat16),
                       preferred_element_type=jnp.float32) + b

    h = jnp.maximum(lin(x, w1, b1), 0.0)
    h = jnp.maximum(lin(h, w2, b2), 0.0)
    h = jnp.maximum(lin(h, w3, b3), 0.0)
    theta = lin(h, w4, b4)
    return theta[:, :input_size], theta[:, input_size:]


if __name__ == "__main__":
    # Small, module-consistent shapes.
    batch = 8
    input_size = 16       # backcast length
    forecast_size = 8     # forecast horizon
    theta_size = input_size + forecast_size
    hidden_size = 32

    key = jax.random.PRNGKey(0)
    k_x, k_p = jax.random.split(key)
    x = jax.random.normal(k_x, (batch, input_size), jnp.float32)
    params = init_params(k_p, input_size, hidden_size, theta_size)

    backcast, forecast = nbeats_block(x, params, input_size, forecast_size)
    jax.block_until_ready((backcast, forecast))

    # Sanity-check against the pure-JAX reference (same bf16 weight path).
    ref_back, ref_fore = nbeats_block_ref(x, params, input_size)
    assert backcast.shape == (batch, input_size)
    assert forecast.shape == (batch, forecast_size)
    assert jnp.allclose(backcast, ref_back, atol=2e-3, rtol=2e-3)
    assert jnp.allclose(forecast, ref_fore, atol=2e-3, rtol=2e-3)

    print("KERNEL_OK")
</pallas_src>

<mosaic_0001>
module attributes {stable_mosaic.version = 11 : i64} {
  func.func @nbeats_block_kernel(%arg0: i32, %arg1: memref<8x128xf32, #tpu.memory_space<vmem>>, %arg2: memref<128x128xbf16, #tpu.memory_space<vmem>>, %arg3: memref<1x128xf32, #tpu.memory_space<vmem>>, %arg4: memref<128x128xbf16, #tpu.memory_space<vmem>>, %arg5: memref<1x128xf32, #tpu.memory_space<vmem>>, %arg6: memref<128x128xbf16, #tpu.memory_space<vmem>>, %arg7: memref<1x128xf32, #tpu.memory_space<vmem>>, %arg8: memref<128x128xbf16, #tpu.memory_space<vmem>>, %arg9: memref<1x128xf32, #tpu.memory_space<vmem>>, %arg10: memref<128x128xbf16, #tpu.memory_space<vmem>>, %arg11: memref<1x128xf32, #tpu.memory_space<vmem>>, %arg12: memref<8x128xf32, #tpu.memory_space<vmem>>, %arg13: memref<8x128xf32, #tpu.memory_space<vmem>>) attributes {dimension_semantics = [#tpu.dimension_semantics<parallel>], iteration_bounds = array<i64: 1>, scalar_prefetch = 0 : i64, scratch_operands = 0 : i64, tpu.core_type = #tpu.core_type<tc>, window_params = [{transform_indices = @transform_0, window_bounds = array<i64: 8, 128>}, {pipeline_mode = #tpu.pipeline_mode<synchronous>, transform_indices = @transform_1, window_bounds = array<i64: 128, 128>}, {pipeline_mode = #tpu.pipeline_mode<synchronous>, transform_indices = @transform_2, window_bounds = array<i64: 1, 128>}, {pipeline_mode = #tpu.pipeline_mode<synchronous>, transform_indices = @transform_3, window_bounds = array<i64: 128, 128>}, {pipeline_mode = #tpu.pipeline_mode<synchronous>, transform_indices = @transform_4, window_bounds = array<i64: 1, 128>}, {pipeline_mode = #tpu.pipeline_mode<synchronous>, transform_indices = @transform_5, window_bounds = array<i64: 128, 128>}, {pipeline_mode = #tpu.pipeline_mode<synchronous>, transform_indices = @transform_6, window_bounds = array<i64: 1, 128>}, {pipeline_mode = #tpu.pipeline_mode<synchronous>, transform_indices = @transform_7, window_bounds = array<i64: 128, 128>}, {pipeline_mode = #tpu.pipeline_mode<synchronous>, transform_indices = @transform_8, window_bounds = array<i64: 1, 128>}, {pipeline_mode = #tpu.pipeline_mode<synchronous>, transform_indices = @transform_9, window_bounds = array<i64: 128, 128>}, {pipeline_mode = #tpu.pipeline_mode<synchronous>, transform_indices = @transform_10, window_bounds = array<i64: 1, 128>}, {transform_indices = @transform_11, window_bounds = array<i64: 8, 128>}, {transform_indices = @transform_12, window_bounds = array<i64: 8, 128>}]} {
    %c0 = arith.constant 0 : index
    %c0_0 = arith.constant 0 : index
    %0 = vector.load %arg1[%c0, %c0_0] : memref<8x128xf32, #tpu.memory_space<vmem>>, vector<8x128xf32>
    %1 = arith.truncf %0 : vector<8x128xf32> to vector<8x128xbf16>
    %c0_1 = arith.constant 0 : index
    %c0_2 = arith.constant 0 : index
    %2 = vector.load %arg2[%c0_1, %c0_2] : memref<128x128xbf16, #tpu.memory_space<vmem>>, vector<128x128xbf16>
    %cst = arith.constant dense<0.000000e+00> : vector<8x128xf32>
    %3 = tpu.matmul %1, %2, %cst {dimension_numbers = #tpu.dot_dimension_numbers<[1], [0], [0], [1], [0, 0, 1, 1], [], []>} : vector<8x128xbf16>, vector<128x128xbf16>, vector<8x128xf32> -> vector<8x128xf32>
    %c0_3 = arith.constant 0 : index
    %c0_4 = arith.constant 0 : index
    %4 = vector.load %arg3[%c0_3, %c0_4] : memref<1x128xf32, #tpu.memory_space<vmem>>, vector<1x128xf32>
    %5 = vector.broadcast %4 : vector<1x128xf32> to vector<8x128xf32>
    %6 = arith.addf %3, %5 : vector<8x128xf32>
    %cst_5 = arith.constant 0.000000e+00 : f32
    %7 = vector.broadcast %cst_5 : f32 to vector<8x128xf32>
    %8 = arith.maximumf %6, %7 : vector<8x128xf32>
    %9 = arith.truncf %8 : vector<8x128xf32> to vector<8x128xbf16>
    %c0_6 = arith.constant 0 : index
    %c0_7 = arith.constant 0 : index
    %10 = vector.load %arg4[%c0_6, %c0_7] : memref<128x128xbf16, #tpu.memory_space<vmem>>, vector<128x128xbf16>
    %cst_8 = arith.constant dense<0.000000e+00> : vector<8x128xf32>
    %11 = tpu.matmul %9, %10, %cst_8 {dimension_numbers = #tpu.dot_dimension_numbers<[1], [0], [0], [1], [0, 0, 1, 1], [], []>} : vector<8x128xbf16>, vector<128x128xbf16>, vector<8x128xf32> -> vector<8x128xf32>
    %c0_9 = arith.constant 0 : index
    %c0_10 = arith.constant 0 : index
    %12 = vector.load %arg5[%c0_9, %c0_10] : memref<1x128xf32, #tpu.memory_space<vmem>>, vector<1x128xf32>
    %13 = vector.broadcast %12 : vector<1x128xf32> to vector<8x128xf32>
    %14 = arith.addf %11, %13 : vector<8x128xf32>
    %cst_11 = arith.constant 0.000000e+00 : f32
    %15 = vector.broadcast %cst_11 : f32 to vector<8x128xf32>
    %16 = arith.maximumf %14, %15 : vector<8x128xf32>
    %17 = arith.truncf %16 : vector<8x128xf32> to vector<8x128xbf16>
    %c0_12 = arith.constant 0 : index
    %c0_13 = arith.constant 0 : index
    %18 = vector.load %arg6[%c0_12, %c0_13] : memref<128x128xbf16, #tpu.memory_space<vmem>>, vector<128x128xbf16>
    %cst_14 = arith.constant dense<0.000000e+00> : vector<8x128xf32>
    %19 = tpu.matmul %17, %18, %cst_14 {dimension_numbers = #tpu.dot_dimension_numbers<[1], [0], [0], [1], [0, 0, 1, 1], [], []>} : vector<8x128xbf16>, vector<128x128xbf16>, vector<8x128xf32> -> vector<8x128xf32>
    %c0_15 = arith.constant 0 : index
    %c0_16 = arith.constant 0 : index
    %20 = vector.load %arg7[%c0_15, %c0_16] : memref<1x128xf32, #tpu.memory_space<vmem>>, vector<1x128xf32>
    %21 = vector.broadcast %20 : vector<1x128xf32> to vector<8x128xf32>
    %22 = arith.addf %19, %21 : vector<8x128xf32>
    %cst_17 = arith.constant 0.000000e+00 : f32
    %23 = vector.broadcast %cst_17 : f32 to vector<8x128xf32>
    %24 = arith.maximumf %22, %23 : vector<8x128xf32>
    %25 = arith.truncf %24 : vector<8x128xf32> to vector<8x128xbf16>
    %c0_18 = arith.constant 0 : index
    %c0_19 = arith.constant 0 : index
    %26 = vector.load %arg8[%c0_18, %c0_19] : memref<128x128xbf16, #tpu.memory_space<vmem>>, vector<128x128xbf16>
    %cst_20 = arith.constant dense<0.000000e+00> : vector<8x128xf32>
    %27 = tpu.matmul %25, %26, %cst_20 {dimension_numbers = #tpu.dot_dimension_numbers<[1], [0], [0], [1], [0, 0, 1, 1], [], []>} : vector<8x128xbf16>, vector<128x128xbf16>, vector<8x128xf32> -> vector<8x128xf32>
    %c0_21 = arith.constant 0 : index
    %c0_22 = arith.constant 0 : index
    %28 = vector.load %arg9[%c0_21, %c0_22] : memref<1x128xf32, #tpu.memory_space<vmem>>, vector<1x128xf32>
    %29 = vector.broadcast %28 : vector<1x128xf32> to vector<8x128xf32>
    %30 = arith.addf %27, %29 : vector<8x128xf32>
    %c0_23 = arith.constant 0 : index
    %c0_24 = arith.constant 0 : index
    %31 = vector.load %arg12[%c0_23, %c0_24] : memref<8x128xf32, #tpu.memory_space<vmem>>, vector<8x128xf32>
    tpu.vector_store %arg12[%c0_23, %c0_24], %30 {strides = array<i32>} : memref<8x128xf32, #tpu.memory_space<vmem>>, vector<8x128xf32>,
    %c0_25 = arith.constant 0 : index
    %c0_26 = arith.constant 0 : index
    %32 = vector.load %arg10[%c0_25, %c0_26] : memref<128x128xbf16, #tpu.memory_space<vmem>>, vector<128x128xbf16>
    %cst_27 = arith.constant dense<0.000000e+00> : vector<8x128xf32>
    %33 = tpu.matmul %25, %32, %cst_27 {dimension_numbers = #tpu.dot_dimension_numbers<[1], [0], [0], [1], [0, 0, 1, 1], [], []>} : vector<8x128xbf16>, vector<128x128xbf16>, vector<8x128xf32> -> vector<8x128xf32>
    %c0_28 = arith.constant 0 : index
    %c0_29 = arith.constant 0 : index
    %34 = vector.load %arg11[%c0_28, %c0_29] : memref<1x128xf32, #tpu.memory_space<vmem>>, vector<1x128xf32>
    %35 = vector.broadcast %34 : vector<1x128xf32> to vector<8x128xf32>
    %36 = arith.addf %33, %35 : vector<8x128xf32>
    %c0_30 = arith.constant 0 : index
    %c0_31 = arith.constant 0 : index
    %37 = vector.load %arg13[%c0_30, %c0_31] : memref<8x128xf32, #tpu.memory_space<vmem>>, vector<8x128xf32>
    tpu.vector_store %arg13[%c0_30, %c0_31], %36 {strides = array<i32>} : memref<8x128xf32, #tpu.memory_space<vmem>>, vector<8x128xf32>,
    return
  }
  func.func @transform_0(%arg0: i32) -> (i32, i32) {
    %c0_i32 = arith.constant 0 : i32
    %c0_i32_0 = arith.constant 0 : i32
    return %arg0, %c0_i32 : i32, i32
  }
  func.func @transform_1(%arg0: i32) -> (i32, i32) {
    %c0_i32 = arith.constant 0 : i32
    %c0_i32_0 = arith.constant 0 : i32
    %c0_i32_1 = arith.constant 0 : i32
    return %c0_i32, %c0_i32_0 : i32, i32
  }
  func.func @transform_2(%arg0: i32) -> (i32, i32) {
    %c0_i32 = arith.constant 0 : i32
    %c0_i32_0 = arith.constant 0 : i32
    %c0_i32_1 = arith.constant 0 : i32
    return %c0_i32, %c0_i32_0 : i32, i32
  }
  func.func @transform_3(%arg0: i32) -> (i32, i32) {
    %c0_i32 = arith.constant 0 : i32
    %c0_i32_0 = arith.constant 0 : i32
    %c0_i32_1 = arith.constant 0 : i32
    return %c0_i32, %c0_i32_0 : i32, i32
  }
  func.func @transform_4(%arg0: i32) -> (i32, i32) {
    %c0_i32 = arith.constant 0 : i32
    %c0_i32_0 = arith.constant 0 : i32
    %c0_i32_1 = arith.constant 0 : i32
    return %c0_i32, %c0_i32_0 : i32, i32
  }
  func.func @transform_5(%arg0: i32) -> (i32, i32) {
    %c0_i32 = arith.constant 0 : i32
    %c0_i32_0 = arith.constant 0 : i32
    %c0_i32_1 = arith.constant 0 : i32
    return %c0_i32, %c0_i32_0 : i32, i32
  }
  func.func @transform_6(%arg0: i32) -> (i32, i32) {
    %c0_i32 = arith.constant 0 : i32
    %c0_i32_0 = arith.constant 0 : i32
    %c0_i32_1 = arith.constant 0 : i32
    return %c0_i32, %c0_i32_0 : i32, i32
  }
  func.func @transform_7(%arg0: i32) -> (i32, i32) {
    %c0_i32 = arith.constant 0 : i32
    %c0_i32_0 = arith.constant 0 : i32
    %c0_i32_1 = arith.constant 0 : i32
    return %c0_i32, %c0_i32_0 : i32, i32
  }
  func.func @transform_8(%arg0: i32) -> (i32, i32) {
    %c0_i32 = arith.constant 0 : i32
    %c0_i32_0 = arith.constant 0 : i32
    %c0_i32_1 = arith.constant 0 : i32
    return %c0_i32, %c0_i32_0 : i32, i32
  }
  func.func @transform_9(%arg0: i32) -> (i32, i32) {
    %c0_i32 = arith.constant 0 : i32
    %c0_i32_0 = arith.constant 0 : i32
    %c0_i32_1 = arith.constant 0 : i32
    return %c0_i32, %c0_i32_0 : i32, i32
  }
  func.func @transform_10(%arg0: i32) -> (i32, i32) {
    %c0_i32 = arith.constant 0 : i32
    %c0_i32_0 = arith.constant 0 : i32
    %c0_i32_1 = arith.constant 0 : i32
    return %c0_i32, %c0_i32_0 : i32, i32
  }
  func.func @transform_11(%arg0: i32) -> (i32, i32) {
    %c0_i32 = arith.constant 0 : i32
    %c0_i32_0 = arith.constant 0 : i32
    return %arg0, %c0_i32 : i32, i32
  }
  func.func @transform_12(%arg0: i32) -> (i32, i32) {
    %c0_i32 = arith.constant 0 : i32
    %c0_i32_0 = arith.constant 0 : i32
    return %arg0, %c0_i32 : i32, i32
  }
}

</mosaic_0001>

<bundles_post_ra>
// kernel: nbeats_block.1
= control target key start
LH: loop header
LB: loop body
LE: loop exit
PB: predicated region body
PF: predicated region fallthrough
CT: control target
= control target key end

     0   :  { %18 = vsyncpa [#allocation3], 0  ;;  %v914_v1 = vmov 0.0   ;;  %vm915_vm0 = vmmov 0   ;;  %s1177_s0 = inlined_call_operand.vmem [shape: f32[8,128], index: 0, kind: input, shape index: {}]   ;;  %s1178_s1 = inlined_call_operand.vmem [shape: bf16[128,128], index: 1, kind: input, shape index: {}]   ;;  %s1179_s2 = inlined_call_operand.vmem [shape: f32[1,128], index: 2, kind: input, shape index: {}]   ;;  %s1180_s3 = inlined_call_operand.vmem [shape: bf16[128,128], index: 3, kind: input, shape index: {}]   ;;  %s1181_s4 = inlined_call_operand.vmem [shape: f32[1,128], index: 4, kind: input, shape index: {}]   ;;  %s1182_s5 = inlined_call_operand.vmem [shape: bf16[128,128], index: 5, kind: input, shape index: {}]   ;;  %s1183_s6 = inlined_call_operand.vmem [shape: f32[1,128], index: 6, kind: input, shape index: {}]   ;;  %s1184_s7 = inlined_call_operand.vmem [shape: bf16[128,128], index: 7, kind: input, shape index: {}]   ;;  %s1185_s8 = inlined_call_operand.vmem [shape: f32[1,128], index: 8, kind: input, shape index: {}]   ;;  %s1186_s9 = inlined_call_operand.vmem [shape: bf16[128,128], index: 9, kind: input, shape index: {}]   ;;  %s1187_s10 = inlined_call_operand.vmem [shape: f32[1,128], index: 10, kind: input, shape index: {}]   ;;  %s1188_s11 = inlined_call_operand.hbm [shape: f32[8,128], index: 11, kind: output, shape index: {0}]   ;;  %s1189_s12 = inlined_call_operand.hbm [shape: f32[8,128], index: 12, kind: output, shape index: {1}]  }
   0x1   :  { %v830_v0 = vld [vmem:[%s1178_s1 + $0x38] sm:$0xff]   ;;  %726 = vmatprep.subr.bf16.mxu0 %v914_v1  ;;  %746 = vmatprep.subr.bf16.mxu1 %v914_v1  ;;  %v831_v2 = vld [vmem:[%s1178_s1 + $0x30] sm:$0xff]   ;;  %v832_v3 = vld [vmem:[%s1178_s1 + $0x28] sm:$0xff]  }
   0x2   :  { %727 = vmatpush3.bf16.msra.mxu0 %v830_v0  ;;  %742 = vmatprep.mubr.msk.bf16.mxu0 %vm915_vm0, %v914_v1  ;;  %v838_v4 = vld [vmem:[%s1180_s3 + $0x38] sm:$0xff]   ;;  %v833_v5 = vld [vmem:[%s1178_s1 + $0x20] sm:$0xff]   ;;  %v839_v6 = vld [vmem:[%s1180_s3 + $0x30] sm:$0xff]  }
   0x3   :  { %728 = vmatprep.subr.bf16.mxu0 %v914_v1  ;;  %762 = vmatprep.mubr.msk.bf16.mxu1 %vm915_vm0, %v914_v1  ;;  %v834_v7 = vld [vmem:[%s1178_s1 + $0x18] sm:$0xff]   ;;  %v840_v8 = vld [vmem:[%s1180_s3 + $0x28] sm:$0xff]   ;;  %v835_v9 = vld [vmem:[%s1178_s1 + $0x10] sm:$0xff]  }
   0x4   :  { %747 = vmatpush3.bf16.msra.mxu1 %v838_v4  ;;  %v841_v10 = vld [vmem:[%s1180_s3 + $0x20] sm:$0xff]   ;;  %v836_v11 = vld [vmem:[%s1178_s1 + $0x8] sm:$0xff]   ;;  %v842_v12 = vld [vmem:[%s1180_s3 + $0x18] sm:$0xff]  }
   0x5   :  { %748 = vmatprep.subr.bf16.mxu1 %v914_v1  ;;  %v837_v13 = vld [vmem:[%s1178_s1] sm:$0xff]   ;;  %v843_v15 = vld [vmem:[%s1180_s3 + $0x10] sm:$0xff]  }
   0x6   :  { %729 = vmatpush3.bf16.msra.mxu0 %v831_v2  ;;  %v43_v14 = vld [vmem:[%s1177_s0] sm:$0xff] }
   0x7   :  { %730 = vmatprep.subr.bf16.mxu0 %v914_v1  ;;  %v44_v16 = vpack.c.bf16 %v43_v14, %v43_v14 }
   0x8   :  { %749 = vmatpush3.bf16.msra.mxu1 %v839_v6 }
   0x9   :  { %750 = vmatprep.subr.bf16.mxu1 %v914_v1 }
   0xa   :  { %731 = vmatpush3.bf16.msra.mxu0 %v832_v3 }
   0xb   :  { %732 = vmatprep.subr.bf16.mxu0 %v914_v1 }
   0xc   :  { %751 = vmatpush3.bf16.msra.mxu1 %v840_v8 }
   0xd   :  { %752 = vmatprep.subr.bf16.mxu1 %v914_v1 }
   0xe   :  { %733 = vmatpush3.bf16.msra.mxu0 %v833_v5 }
   0xf   :  { %734 = vmatprep.subr.bf16.mxu0 %v914_v1 }
  0x10   :  { %753 = vmatpush3.bf16.msra.mxu1 %v841_v10 }
  0x11   :  { %754 = vmatprep.subr.bf16.mxu1 %v914_v1 }
  0x12   :  { %735 = vmatpush3.bf16.msra.mxu0 %v834_v7 }
  0x13   :  { %736 = vmatprep.subr.bf16.mxu0 %v914_v1 }
  0x14   :  { %755 = vmatpush3.bf16.msra.mxu1 %v842_v12 }
  0x15   :  { %756 = vmatprep.subr.bf16.mxu1 %v914_v1 }
  0x16   :  { %737 = vmatpush3.bf16.msra.mxu0 %v835_v9 }
  0x17   :  { %738 = vmatprep.subr.bf16.mxu0 %v914_v1 }
  0x18   :  { %757 = vmatpush3.bf16.msra.mxu1 %v843_v15 }
  0x19   :  { %758 = vmatprep.subr.bf16.mxu1 %v914_v1 }
  0x1a   :  { %739 = vmatpush3.bf16.msra.mxu0 %v836_v11 }
  0x1b   :  { %740 = vmatprep.subr.bf16.mxu0 %v914_v1 }
  0x1e   :  { %741 = vmatpush3.bf16.msra.mxu0 %v837_v13 }
  0x1f   :  { %766 = vmatprep.subr.bf16.mxu0 %v914_v1 }
  0x20   :  { %19 = vsyncpa [#allocation5], 0  ;;  %v844_v17 = vld [vmem:[%s1180_s3 + $0x8] sm:$0xff]   ;;  %v845_v18 = vld [vmem:[%s1180_s3] sm:$0xff]   ;;  %s916_s25 = smov [#allocation2]  }
  0x21   :  { %743 = vmatmul.mubr.bf16.vlgmr.msra.gmra.mxu0 %v44_v16  ;;  %759 = vmatpush3.bf16.msra.mxu1 %v844_v17  ;;  %v846_v19 = vld [vmem:[%s1182_s5 + $0x38] sm:$0xff]   ;;  %v847_v20 = vld [vmem:[%s1182_s5 + $0x30] sm:$0xff]   ;;  %v848_v21 = vld [vmem:[%s1182_s5 + $0x28] sm:$0xff]   ;;  %s614_s26 = sshll.u32 %s916_s25, 4  ;;  %s615_s26 = int_to_ptr.vmem [resolvable:$true] %s614_s26 }
  0x22   :  { %782 = vmatprep.mubr.msk.bf16.mxu0 %vm915_vm0, %v914_v1  ;;  %760 = vmatprep.subr.bf16.mxu1 %v914_v1  ;;  %v849_v22 = vld [vmem:[%s1182_s5 + $0x20] sm:$0xff]   ;;  %v850_v23 = vld [vmem:[%s1182_s5 + $0x18] sm:$0xff]   ;;  %v851_v24 = vld [vmem:[%s1182_s5 + $0x10] sm:$0xff]   ;;  %p875_p1 = scmp.lt.s32.totalorder %s615_s26, %s615_s26 }
  0x23   :  { %767 = vmatpush3.bf16.msra.mxu0 %v846_v19  ;;  %v636_v25 = vld [vmem:[%s1179_s2] ss:$0 sm:$0xff]  ;;  %v852_v33 = vld [vmem:[%s1182_s5 + $0x8] sm:$0xff]   ;;  %v854_v35 = vld [vmem:[%s1184_s7 + $0x38] sm:$0xff]  }
  0x24   :  { %768 = vmatprep.subr.bf16.mxu0 %v914_v1  ;;  %v853_v34 = vld [vmem:[%s1182_s5] sm:$0xff]   ;;  %v856_v36 = vld [vmem:[%s1184_s7 + $0x30] sm:$0xff]   ;;  %v858_v37 = vld [vmem:[%s1184_s7 + $0x28] sm:$0xff]  }
  0x25   :  { %761 = vmatpush3.bf16.msra.mxu1 %v845_v18  ;;  %v860_v38 = vld [vmem:[%s1184_s7 + $0x20] sm:$0xff]   ;;  %v862_v39 = vld [vmem:[%s1184_s7 + $0x18] sm:$0xff]   ;;  %v864_v40 = vld [vmem:[%s1184_s7 + $0x10] sm:$0xff]  }
  0x26   :  { %786 = vmatprep.subr.bf16.mxu1 %v914_v1  ;;  %v645_v41 = vld [vmem:[%s1181_s4] ss:$0 sm:$0xff]  ;;  %v855_v47 = vld [vmem:[%s1186_s9 + $0x38] sm:$0xff]   ;;  %v857_v50 = vld [vmem:[%s1186_s9 + $0x30] sm:$0xff]  }
  0x27   :  { %769 = vmatpush3.bf16.msra.mxu0 %v847_v20  ;;  %v859_v51 = vld [vmem:[%s1186_s9 + $0x28] sm:$0xff]   ;;  %v861_v52 = vld [vmem:[%s1186_s9 + $0x20] sm:$0xff]   ;;  %v863_v53 = vld [vmem:[%s1186_s9 + $0x18] sm:$0xff]  }
  0x28   :  { %770 = vmatprep.subr.bf16.mxu0 %v914_v1  ;;  %v865_v54 = vld [vmem:[%s1186_s9 + $0x10] sm:$0xff]   ;;  %v866_v55 = vld [vmem:[%s1184_s7 + $0x8] sm:$0xff]   ;;  %v868_v57 = vld [vmem:[%s1184_s7] sm:$0xff]  }
  0x29   :  { %v867_v56 = vld [vmem:[%s1186_s9 + $0x8] sm:$0xff]   ;;  %v869_v58 = vld [vmem:[%s1186_s9] sm:$0xff]  }
  0x2a   :  { %v654_v59 = vld [vmem:[%s1183_s6] ss:$0 sm:$0xff]  ;;  %s917_s6 = smov [#allocation4]  }
  0x2b   :  { %771 = vmatpush3.bf16.msra.mxu0 %v848_v21  ;;  %v663_v3 = vld [vmem:[%s1185_s8] ss:$0 sm:$0xff]  ;;  %s624_s27 = sshll.u32 %s917_s6, 4  ;;  %s870_s8 = scalar_lea.vmem %s615_s26, 128  ;;  %s625_s27 = int_to_ptr.vmem [resolvable:$true] %s624_s27 }
  0x2c   :  { %772 = vmatprep.subr.bf16.mxu0 %v914_v1  ;;  %v672_v4 = vld [vmem:[%s1187_s10] ss:$0 sm:$0xff]  ;;  %p871_p0 = scmp.ne.s32.totalorder %s615_s26, %s870_s8  ;;  %p876_p2 = scmp.lt.s32.totalorder %s870_s8, %s870_s8 }
  0x2e   :  { %p877_p3 = por %p876_p2, %p875_p1 }
  0x2f   :  { %773 = vmatpush3.bf16.msra.mxu0 %v849_v22 }
  0x30   :  { %774 = vmatprep.subr.bf16.mxu0 %v914_v1  ;;  %p878_p4 = pnand %p877_p3, %p871_p0 }
  0x33   :  { %775 = vmatpush3.bf16.msra.mxu0 %v850_v23 }
  0x34   :  { %776 = vmatprep.subr.bf16.mxu0 %v914_v1 }
  0x37   :  { %777 = vmatpush3.bf16.msra.mxu0 %v851_v24 }
  0x38   :  { %778 = vmatprep.subr.bf16.mxu0 %v914_v1 }
  0x3b   :  { %779 = vmatpush3.bf16.msra.mxu0 %v852_v33 }
  0x3c   :  { %780 = vmatprep.subr.bf16.mxu0 %v914_v1 }
  0x3f   :  { %781 = vmatpush3.bf16.msra.mxu0 %v853_v34 }
  0x40   :  { %806 = vmatprep.subr.bf16.mxu0 %v914_v1 }
  0xe1   :  { %v150_v26 = vpop.f32.mrf.mxu0 }
  0xe2   :  { %v151_v27 = vadd.f32 %v636_v25, %v150_v26 }
  0xe3   :  { %v744_v28 = vpop.f32.mrf.mxu0 }
  0xe4   :  { %v156_v29 = vmax.f32 %v151_v27, 0.0 }
  0xe5   :  { %v153_v30 = vpop.f32.mrf.mxu0 }
  0xe6   :  { %v157_v31 = vpack.c.bf16 %v156_v29, %v156_v29 }
  0xe7   :  { %v745_v32 = vpop.f32.mrf.mxu0 }
  0xe8   :  { %763 = vmatmul.mubr.bf16.vlgmr.msra.gmra.mxu1 %v157_v31 }
  0xe9   :  { %802 = vmatprep.mubr.msk.bf16.mxu1 %vm915_vm0, %v914_v1  ;;  %787 = vmatpush3.bf16.msra.mxu1 %v854_v35 }
  0xea   :  { %788 = vmatprep.subr.bf16.mxu1 %v914_v1 }
  0xed   :  { %789 = vmatpush3.bf16.msra.mxu1 %v856_v36 }
  0xee   :  { %790 = vmatprep.subr.bf16.mxu1 %v914_v1 }
  0xf1   :  { %791 = vmatpush3.bf16.msra.mxu1 %v858_v37 }
  0xf2   :  { %792 = vmatprep.subr.bf16.mxu1 %v914_v1 }
  0xf5   :  { %793 = vmatpush3.bf16.msra.mxu1 %v860_v38 }
  0xf6   :  { %794 = vmatprep.subr.bf16.mxu1 %v914_v1 }
  0xf9   :  { %795 = vmatpush3.bf16.msra.mxu1 %v862_v39 }
  0xfa   :  { %796 = vmatprep.subr.bf16.mxu1 %v914_v1 }
  0xfd   :  { %797 = vmatpush3.bf16.msra.mxu1 %v864_v40 }
  0xfe   :  { %798 = vmatprep.subr.bf16.mxu1 %v914_v1 }
 0x101   :  { %799 = vmatpush3.bf16.msra.mxu1 %v866_v55 }
 0x102   :  { %800 = vmatprep.subr.bf16.mxu1 %v914_v1 }
 0x105   :  { %801 = vmatpush3.bf16.msra.mxu1 %v868_v57 }
 0x1a8   :  { %v263_v42 = vpop.f32.mrf.mxu1 }
 0x1a9   :  { %v264_v43 = vadd.f32 %v645_v41, %v263_v42 }
 0x1aa   :  { %v764_v44 = vpop.f32.mrf.mxu1 }
 0x1ab   :  { %v269_v45 = vmax.f32 %v264_v43, 0.0 }
 0x1ac   :  { %v266_v46 = vpop.f32.mrf.mxu1 }
 0x1ad   :  { %v270_v48 = vpack.c.bf16 %v269_v45, %v269_v45 }
 0x1ae   :  { %v765_v49 = vpop.f32.mrf.mxu1 }
 0x1af   :  { %783 = vmatmul.mubr.bf16.vlgmr.msra.gmra.mxu0 %v270_v48 }
 0x1b0   :  { %807 = vmatpush3.bf16.msra.mxu0 %v855_v47  ;;  %822 = vmatprep.mubr.msk.bf16.mxu0 %vm915_vm0, %v914_v1 }
 0x1b1   :  { %808 = vmatprep.subr.bf16.mxu0 %v914_v1 }
 0x1b4   :  { %809 = vmatpush3.bf16.msra.mxu0 %v857_v50 }
 0x1b5   :  { %810 = vmatprep.subr.bf16.mxu0 %v914_v1 }
 0x1b8   :  { %811 = vmatpush3.bf16.msra.mxu0 %v859_v51 }
 0x1b9   :  { %812 = vmatprep.subr.bf16.mxu0 %v914_v1 }
 0x1bc   :  { %813 = vmatpush3.bf16.msra.mxu0 %v861_v52 }
 0x1bd   :  { %814 = vmatprep.subr.bf16.mxu0 %v914_v1 }
 0x1c0   :  { %815 = vmatpush3.bf16.msra.mxu0 %v863_v53 }
 0x1c1   :  { %816 = vmatprep.subr.bf16.mxu0 %v914_v1 }
 0x1c4   :  { %817 = vmatpush3.bf16.msra.mxu0 %v865_v54 }
 0x1c5   :  { %818 = vmatprep.subr.bf16.mxu0 %v914_v1 }
 0x1c8   :  { %819 = vmatpush3.bf16.msra.mxu0 %v867_v56 }
 0x1c9   :  { %820 = vmatprep.subr.bf16.mxu0 %v914_v1 }
 0x1cc   :  { %821 = vmatpush3.bf16.msra.mxu0 %v869_v58 }
 0x26f   :  { %v376_v60 = vpop.f32.mrf.mxu0 }
 0x270   :  { %v377_v61 = vadd.f32 %v654_v59, %v376_v60 }
 0x271   :  { %v784_v62 = vpop.f32.mrf.mxu0 }
 0x272   :  { %v382_v63 = vmax.f32 %v377_v61, 0.0 }
 0x273   :  { %v379_v0 = vpop.f32.mrf.mxu0 }
 0x274   :  { %v383_v1 = vpack.c.bf16 %v382_v63, %v382_v63 }
 0x275   :  { %v785_v2 = vpop.f32.mrf.mxu0 }
 0x276   :  { %803 = vmatmul.mubr.bf16.vlgmr.msra.gmra.mxu1 %v383_v1  ;;  %823 = vmatmul.mubr.bf16.vlgmr.msra.gmra.mxu0 %v383_v1 }
 0x336   :  { %v489_v5 = vpop.f32.mrf.mxu1  ;;  %v601_v6 = vpop.f32.mrf.mxu0 }
 0x337   :  { %v490_v7 = vadd.f32 %v663_v3, %v489_v5  ;;  %v602_v8 = vadd.f32 %v672_v4, %v601_v6 }
 0x338   :  { %v804_v9 = vpop.f32.mrf.mxu1  ;;  %v824_v10 = vpop.f32.mrf.mxu0 }
 0x339   :  { %495 = vst [vmem:[#allocation2] sm:$0xff] %v490_v7  ;;  %607 = vst [vmem:[#allocation4] sm:$0xff] %v602_v8 }
 0x33a   :  { %v492_v11 = vpop.f32.mrf.mxu1  ;;  %v604_v12 = vpop.f32.mrf.mxu0 }
 0x33b   :  { %881 = shalt.err (!%p878_p4)
}
 0x33c   :  { %617 = dma.vmem_to_hbm [thread:$0]  %s615_s26, 128, %s1188_s11, [#allocation3]  }
 0x33d   :  { %s890_s4 = scalar_lea.vmem %s625_s27, 128  ;;  %p895_p6 = scmp.lt.s32.totalorder %s625_s27, %s625_s27 }
 0x33e   :  { %p891_p5 = scmp.ne.s32.totalorder %s625_s27, %s890_s4  ;;  %p896_p7 = scmp.lt.s32.totalorder %s890_s4, %s890_s4 }
 0x340   :  { %p897_p8 = por %p896_p7, %p895_p6 }
 0x342   :  { %p898_p9 = pnand %p897_p8, %p891_p5 }
 0x344   :  { %901 = shalt.err (!%p898_p9)
}
 0x345   :  { %627 = dma.vmem_to_hbm [thread:$0]  %s625_s27, 128, %s1189_s12, [#allocation5]   ;;  %v805_v13 = vpop.f32.mrf.mxu1  ;;  %v825_v14 = vpop.f32.mrf.mxu0 }
 0x346   :  { %910 = dma.done.wait [#allocation3], 128  }
 0x347   :  { %911 = vsyncadd [#allocation3], 4294967168 }
 0x348   :  { %912 = dma.done.wait [#allocation5], 128  }
 0x349   :  { %913 = vsyncadd [#allocation5], 4294967168 }
 0x34a   :  { %634 = vsyncpa [#allocation3], 1 }
 0x34b   :  { %635 = vsyncpa [#allocation5], 1 }

</bundles_post_ra>
